<compile_context>
chip_gen: v6e
topology: v6e:2x2x1
jax: 0.10.0
libtpu: 0.0.40
codegen_flags: <defaults>
</compile_context>

<pallas_src>
import functools
from typing import NamedTuple, Optional

import jax
import jax.numpy as jnp
from jax.experimental import pallas as pl
from jax.experimental.pallas import tpu as pltpu

_LANE = 128
_SUBLANE = 8

# Conservative budgets that are safe on every generation:
#   v7x: 64 MiB physical VMEM (target <= ~48 MiB scoped)
#   v5e/v6e: 128 MiB physical, 16/32 MiB scoped defaults -> must be raised.
_VMEM_BUDGET = 40 * 1024 * 1024          # target for all pipelined blocks
_VMEM_LIMIT = 48 * 1024 * 1024           # scoped limit handed to Mosaic
_RESIDENT_W_BUDGET = 16 * 1024 * 1024    # tile Hp once weights exceed this
_MAX_TM = 1024                           # 512/1024 tiles ~ 85% of HBM roofline


def _round_up(n, m):
    return ((n + m - 1) // m) * m


# ----------------------------------------------------------------------------
# Kernel
# ----------------------------------------------------------------------------
def _rnn_cell_kernel(*refs, non_linearity, has_hidden):
    if has_hidden:
        x_ref, h_ref, wx_ref, wh_ref, b_ref, out_ref = refs
    else:
        x_ref, wx_ref, b_ref, out_ref = refs

    mxu_dtype = wx_ref.dtype
    x = x_ref[...]
    if x.dtype != mxu_dtype:
        x = x.astype(mxu_dtype)          # in-VMEM cast: no extra HBM traffic
    # Two K-chunks feeding the same f32 accumulator (one MXU stream).
    pre = jnp.dot(x, wx_ref[...], preferred_element_type=jnp.float32)
    if has_hidden:
        h = h_ref[...]
        if h.dtype != mxu_dtype:
            h = h.astype(mxu_dtype)
        pre = pre + jnp.dot(h, wh_ref[...], preferred_element_type=jnp.float32)
    pre = pre + b_ref[...]               # f32 bias add (VPU)
    if non_linearity == "tanh":
        act = jnp.tanh(pre)              # EUP
    else:
        act = jnp.maximum(pre, 0.0)      # VPU
    out_ref[...] = act.astype(out_ref.dtype)


# ----------------------------------------------------------------------------
# One-time parameter preparation (hoisted out of the per-step path)
# ----------------------------------------------------------------------------
class RNNCellParams(NamedTuple):
    wx: jax.Array          # (D_in, Hp)  padded, MXU dtype
    wh: jax.Array          # (H,   Hp)   padded, MXU dtype
    b: jax.Array           # (1,   Hp)   f32, bx + bh
    input_dim: int
    hidden_dim: int
    tn: int                # Hp column tile (multiple of 128, divides Hp)
    non_linearity: str


def prepare_rnn_cell_params(x2h_weight, h2h_weight, x2h_bias, h2h_bias, *,
                            non_linearity="tanh", mxu_dtype=jnp.bfloat16):
    """One-time setup: transpose PyTorch-layout weights, cast to the MXU dtype
    (bf16 by default: native on v6e/v7x MXU, halves weight HBM bytes), pad the
    hidden dim to a lane-dense multiple of 128 and fold the two biases."""
    assert non_linearity in ("tanh", "relu")
    H, D_in = x2h_weight.shape
    assert h2h_weight.shape == (H, H)
    if x2h_bias is None:
        x2h_bias = jnp.zeros((H,), jnp.float32)
    if h2h_bias is None:
        h2h_bias = jnp.zeros((H,), jnp.float32)

    wx = jnp.transpose(x2h_weight)                 # (D_in, H)
    wh = jnp.transpose(h2h_weight)                 # (H, H)
    if mxu_dtype is not None:
        wx = wx.astype(mxu_dtype)
        wh = wh.astype(mxu_dtype)
    w_bytes = wx.dtype.itemsize
    b = (x2h_bias + h2h_bias).reshape(1, H).astype(jnp.float32)

    # Lane-dense output columns; tile Hp only once the double-buffered weight
    # footprint would blow the resident budget (bites first on v7x, 64 MiB).
    Hp = _round_up(H, _LANE)
    tn = Hp
    while 2 * (D_in + H) * tn * w_bytes > _RESIDENT_W_BUDGET and tn > 512:
        tn = max(512, _round_up(tn // 2, _LANE))
    Hp = _round_up(Hp, tn)

    if Hp != H:
        wx = jnp.pad(wx, ((0, 0), (0, Hp - H)))
        wh = jnp.pad(wh, ((0, 0), (0, Hp - H)))
        b = jnp.pad(b, ((0, 0), (0, Hp - H)))

    # NOTE: K (= D_in and H) is deliberately left unpadded — the K blocks use
    # the full extent (always legal) and padding K would force an extra HBM
    # pass over the *activations* every call, which dominates here.
    # TODO(synk): add a K-reduction grid axis for very large D_in + H where
    # even a (K, 512) weight block no longer fits the resident budget.
    return RNNCellParams(wx, wh, b, D_in, H, tn, non_linearity)


# ----------------------------------------------------------------------------
# Per-step forward
# ----------------------------------------------------------------------------
def rnn_cell_apply(params: RNNCellParams, x, hidden=None, *,
                   single_buffer_resident: bool = False):
    """RNN cell forward.  x: (B, D_in); hidden: (B, H) or None (-> zeros)."""
    B, D_in = x.shape
    assert D_in == params.input_dim
    H, tn = params.hidden_dim, params.tn
    Hp = params.wx.shape[1]
    has_hidden = hidden is not None
    if has_hidden:
        assert hidden.shape == (B, H)
    nh = Hp // tn

    x_b = x.dtype.itemsize
    h_b = hidden.dtype.itemsize if has_hidden else 0
    w_b = params.wx.dtype.itemsize
    o_b = x.dtype.itemsize

    # --- batch tile from an explicit VMEM budget (double-buffered blocks) ----
    resident = 2 * ((D_in + (H if has_hidden else 0)) * tn * w_b
                    + _SUBLANE * tn * 4)                       # weights + bias
    per_row = 2 * (D_in * x_b + (H * h_b if has_hidden else 0) + tn * o_b)
    tm_cap = (_VMEM_BUDGET - resident) // per_row
    tm_cap = max(_SUBLANE, min(_MAX_TM, (tm_cap // _SUBLANE) * _SUBLANE))
    nb = pl.cdiv(B, tm_cap)
    # Rebalance so the last (cdiv) tile has minimal padding waste.
    tm = _round_up(pl.cdiv(B, nb), _SUBLANE)

    # v7x: a single batch tile would leave one TensorCore idle — split the Hp
    # axis instead (harmless no-op sharding on single-TC v5e/v6e).
    if nb == 1 and nh == 1 and tn % (2 * _LANE) == 0:
        tn //= 2
        nh = 2

    # Constant-index weight/bias operands: optionally single-buffer them to
    # halve the resident footprint (useful on v7x's 64 MiB VMEM). Off by
    # default for portability; only valid when their index_map is constant.
    if single_buffer_resident and nh == 1:
        def _wspec(shape, imap):
            return pl.BlockSpec(shape, imap, pipeline_mode=pl.Buffered(1))
    else:
        def _wspec(shape, imap):
            return pl.BlockSpec(shape, imap)

    x_spec = pl.BlockSpec((tm, D_in), lambda i, j: (i, 0))
    wx_spec = _wspec((D_in, tn), lambda i, j: (0, j))
    b_spec = _wspec((1, tn), lambda i, j: (0, j))
    out_spec = pl.BlockSpec((tm, tn), lambda i, j: (i, j))

    if has_hidden:
        h_spec = pl.BlockSpec((tm, H), lambda i, j: (i, 0))
        wh_spec = _wspec((H, tn), lambda i, j: (0, j))
        in_specs = [x_spec, h_spec, wx_spec, wh_spec, b_spec]
        inputs = (x, hidden, params.wx, params.wh, params.b)
    else:
        # Dedicated no-hidden path: h @ Wh^T == 0, drop it (bias still = bx+bh).
        in_specs = [x_spec, wx_spec, b_spec]
        inputs = (x, params.wx, params.b)

    kernel = functools.partial(_rnn_cell_kernel,
                               non_linearity=params.non_linearity,
                               has_hidden=has_hidden)

    out = pl.pallas_call(
        kernel,
        out_shape=jax.ShapeDtypeStruct((B, Hp), x.dtype),
        grid=(nb, nh),
        in_specs=in_specs,
        out_specs=out_spec,
        compiler_params=pltpu.CompilerParams(
            dimension_semantics=("parallel", "parallel"),
            vmem_limit_bytes=_VMEM_LIMIT,
        ),
    )(*inputs)

    # TODO(synk): for full-sequence RNNs, fuse the timestep loop into one
    # pallas_call (weights VMEM-resident across steps, carried hidden kept in
    # f32 even when the MXU operands are bf16). The PyTorch module only
    # defines a single-step cell, so it is not done here.

    # Fast path: if H % 128 == 0 no slice/copy is emitted at all.
    return out if Hp == H else out[:, :H]


# ----------------------------------------------------------------------------
# Pure-JAX reference (PyTorch-layout weights)
# ----------------------------------------------------------------------------
def rnn_cell_ref(x, hidden, x2h_weight, h2h_weight, bx, bh, non_linearity="tanh"):
    if hidden is None:
        hidden = jnp.zeros((x.shape[0], h2h_weight.shape[0]), dtype=x.dtype)
    pre = x @ x2h_weight.T + bx + hidden @ h2h_weight.T + bh
    return jnp.tanh(pre) if non_linearity == "tanh" else jnp.maximum(pre, 0.0)


if __name__ == "__main__":
    key = jax.random.PRNGKey(0)
    batch, input_dim, hidden_dim = 8, 16, 32

    k1, k2, k3, k4, k5, k6 = jax.random.split(key, 6)
    # PyTorch-style uniform(-1/sqrt(H), 1/sqrt(H)) init, deterministic.
    bound = 1.0 / (hidden_dim ** 0.5)
    x2h_w = jax.random.uniform(k1, (hidden_dim, input_dim), jnp.float32, -bound, bound)
    h2h_w = jax.random.uniform(k2, (hidden_dim, hidden_dim), jnp.float32, -bound, bound)
    bx = jax.random.uniform(k3, (hidden_dim,), jnp.float32, -bound, bound)
    bh = jax.random.uniform(k4, (hidden_dim,), jnp.float32, -bound, bound)

    x = jax.random.normal(k5, (batch, input_dim), jnp.float32)
    h0 = jax.random.normal(k6, (batch, hidden_dim), jnp.float32)

    # Weight prep done ONCE (transpose + pad + bf16 cast hoisted out of steps).
    params_bf16 = prepare_rnn_cell_params(x2h_w, h2h_w, bx, bh)                      # default bf16 MXU
    params_f32 = prepare_rnn_cell_params(x2h_w, h2h_w, bx, bh, mxu_dtype=None)       # full f32 path
    params_relu = prepare_rnn_cell_params(x2h_w, h2h_w, bx, bh,
                                          non_linearity="relu", mxu_dtype=None)

    ref = rnn_cell_ref(x, h0, x2h_w, h2h_w, bx, bh)

    # Case 1: default bf16 MXU operands, f32 accumulation + epilogue.
    out = jax.block_until_ready(rnn_cell_apply(params_bf16, x, h0))
    assert out.shape == (batch, hidden_dim)
    assert out.dtype == x.dtype
    assert jnp.allclose(out, ref, atol=5e-2), "mismatch (bf16 MXU, tanh)"

    # Case 2: f32 MXU path, tight tolerance.
    out_f32 = jax.block_until_ready(rnn_cell_apply(params_f32, x, h0))
    assert jnp.allclose(out_f32, ref, atol=1e-5, rtol=1e-5), "mismatch (f32, tanh)"

    # Case 3: hidden=None -> dedicated no-hidden kernel path (bias still bx+bh).
    out_none = jax.block_until_ready(rnn_cell_apply(params_f32, x, None))
    ref_none = rnn_cell_ref(x, None, x2h_w, h2h_w, bx, bh)
    assert jnp.allclose(out_none, ref_none, atol=1e-5, rtol=1e-5), "mismatch (hidden=None)"

    # Case 4: relu non-linearity.
    out_relu = jax.block_until_ready(rnn_cell_apply(params_relu, x, h0))
    ref_relu = rnn_cell_ref(x, h0, x2h_w, h2h_w, bx, bh, non_linearity="relu")
    assert jnp.allclose(out_relu, ref_relu, atol=1e-5, rtol=1e-5), "mismatch (relu)"

    print("KERNEL_OK")
</pallas_src>

<mosaic_0001>
module attributes {stable_mosaic.version = 11 : i64} {
  func.func @_rnn_cell_kernel(%arg0: i32, %arg1: i32, %arg2: memref<8x16xf32, #tpu.memory_space<vmem>>, %arg3: memref<8x32xf32, #tpu.memory_space<vmem>>, %arg4: memref<16x128xbf16, #tpu.memory_space<vmem>>, %arg5: memref<32x128xbf16, #tpu.memory_space<vmem>>, %arg6: memref<1x128xf32, #tpu.memory_space<vmem>>, %arg7: memref<8x128xf32, #tpu.memory_space<vmem>>) attributes {dimension_semantics = [#tpu.dimension_semantics<parallel>, #tpu.dimension_semantics<parallel>], iteration_bounds = array<i64: 1, 1>, scalar_prefetch = 0 : i64, scratch_operands = 0 : i64, tpu.core_type = #tpu.core_type<tc>, window_params = [{transform_indices = @transform_0, window_bounds = array<i64: 8, 16>}, {transform_indices = @transform_1, window_bounds = array<i64: 8, 32>}, {transform_indices = @transform_2, window_bounds = array<i64: 16, 128>}, {transform_indices = @transform_3, window_bounds = array<i64: 32, 128>}, {transform_indices = @transform_4, window_bounds = array<i64: 1, 128>}, {transform_indices = @transform_5, window_bounds = array<i64: 8, 128>}]} {
    %c0 = arith.constant 0 : index
    %c0_0 = arith.constant 0 : index
    %0 = vector.load %arg2[%c0, %c0_0] : memref<8x16xf32, #tpu.memory_space<vmem>>, vector<8x16xf32>
    %1 = arith.truncf %0 : vector<8x16xf32> to vector<8x16xbf16>
    %c0_1 = arith.constant 0 : index
    %c0_2 = arith.constant 0 : index
    %2 = vector.load %arg4[%c0_1, %c0_2] : memref<16x128xbf16, #tpu.memory_space<vmem>>, vector<16x128xbf16>
    %cst = arith.constant dense<0.000000e+00> : vector<8x128xf32>
    %3 = tpu.matmul %1, %2, %cst {dimension_numbers = #tpu.dot_dimension_numbers<[1], [0], [0], [1], [0, 0, 1, 1], [], []>} : vector<8x16xbf16>, vector<16x128xbf16>, vector<8x128xf32> -> vector<8x128xf32>
    %c0_3 = arith.constant 0 : index
    %c0_4 = arith.constant 0 : index
    %4 = vector.load %arg3[%c0_3, %c0_4] : memref<8x32xf32, #tpu.memory_space<vmem>>, vector<8x32xf32>
    %5 = arith.truncf %4 : vector<8x32xf32> to vector<8x32xbf16>
    %c0_5 = arith.constant 0 : index
    %c0_6 = arith.constant 0 : index
    %6 = vector.load %arg5[%c0_5, %c0_6] : memref<32x128xbf16, #tpu.memory_space<vmem>>, vector<32x128xbf16>
    %cst_7 = arith.constant dense<0.000000e+00> : vector<8x128xf32>
    %7 = tpu.matmul %5, %6, %cst_7 {dimension_numbers = #tpu.dot_dimension_numbers<[1], [0], [0], [1], [0, 0, 1, 1], [], []>} : vector<8x32xbf16>, vector<32x128xbf16>, vector<8x128xf32> -> vector<8x128xf32>
    %8 = arith.addf %3, %7 : vector<8x128xf32>
    %c0_8 = arith.constant 0 : index
    %c0_9 = arith.constant 0 : index
    %9 = vector.load %arg6[%c0_8, %c0_9] : memref<1x128xf32, #tpu.memory_space<vmem>>, vector<1x128xf32>
    %10 = vector.broadcast %9 : vector<1x128xf32> to vector<8x128xf32>
    %11 = arith.addf %8, %10 : vector<8x128xf32>
    %12 = math.tanh %11 : vector<8x128xf32>
    %c0_10 = arith.constant 0 : index
    %c0_11 = arith.constant 0 : index
    %13 = vector.load %arg7[%c0_10, %c0_11] : memref<8x128xf32, #tpu.memory_space<vmem>>, vector<8x128xf32>
    tpu.vector_store %arg7[%c0_10, %c0_11], %12 {strides = array<i32>} : memref<8x128xf32, #tpu.memory_space<vmem>>, vector<8x128xf32>,
    return
  }
  func.func @transform_0(%arg0: i32, %arg1: i32) -> (i32, i32) {
    %c0_i32 = arith.constant 0 : i32
    %c0_i32_0 = arith.constant 0 : i32
    return %arg0, %c0_i32 : i32, i32
  }
  func.func @transform_1(%arg0: i32, %arg1: i32) -> (i32, i32) {
    %c0_i32 = arith.constant 0 : i32
    %c0_i32_0 = arith.constant 0 : i32
    return %arg0, %c0_i32 : i32, i32
  }
  func.func @transform_2(%arg0: i32, %arg1: i32) -> (i32, i32) {
    %c0_i32 = arith.constant 0 : i32
    %c0_i32_0 = arith.constant 0 : i32
    return %c0_i32, %arg1 : i32, i32
  }
  func.func @transform_3(%arg0: i32, %arg1: i32) -> (i32, i32) {
    %c0_i32 = arith.constant 0 : i32
    %c0_i32_0 = arith.constant 0 : i32
    return %c0_i32, %arg1 : i32, i32
  }
  func.func @transform_4(%arg0: i32, %arg1: i32) -> (i32, i32) {
    %c0_i32 = arith.constant 0 : i32
    %c0_i32_0 = arith.constant 0 : i32
    return %c0_i32, %arg1 : i32, i32
  }
  func.func @transform_5(%arg0: i32, %arg1: i32) -> (i32, i32) {
    %c0_i32 = arith.constant 0 : i32
    return %arg0, %arg1 : i32, i32
  }
}

</mosaic_0001>

<bundles_post_ra>
// kernel: tpu_custom_call.1
= control target key start
LH: loop header
LB: loop body
LE: loop exit
PB: predicated region body
PF: predicated region fallthrough
CT: control target
= control target key end

     0   :  { %10 = vsyncpa [#allocation3], 0  ;;  %s420_s0 = inlined_call_operand.hbm [shape: f32[8,16], index: 0, kind: input, shape index: {}]   ;;  %s421_s1 = inlined_call_operand.hbm [shape: f32[8,32], index: 1, kind: input, shape index: {}]   ;;  %s422_s2 = inlined_call_operand.hbm [shape: bf16[16,128], index: 2, kind: input, shape index: {}]   ;;  %s423_s3 = inlined_call_operand.hbm [shape: bf16[32,128], index: 3, kind: input, shape index: {}]   ;;  %s424_s4 = inlined_call_operand.vmem [shape: f32[1,128], index: 4, kind: input, shape index: {}]   ;;  %s425_s5 = inlined_call_operand.hbm [shape: f32[8,128], index: 5, kind: output, shape index: {}]  }
   0x1   :  { %11 = vsyncpa [#allocation6], 0 }
   0x2   :  { %12 = vsyncpa [#allocation9], 0 }
   0x3   :  { %13 = vsyncpa [#allocation4], 0  ;;  %s363_s18 = smov [#allocation5]   ;;  %s364_s20 = smov [#allocation2]  }
   0x4   :  { %s30_s19 = sshll.u32 %s363_s18, 4  ;;  %s20_s21 = sshll.u32 %s364_s20, 4  ;;  %s31_s19 = int_to_ptr.vmem [resolvable:$true] %s30_s19  ;;  %s21_s21 = int_to_ptr.vmem [resolvable:$true] %s20_s21 }
   0x5   :  { %s263_s22 = scalar_lea.vmem %s31_s19, 128  ;;  %p268_p1 = scmp.lt.s32.totalorder %s31_s19, %s31_s19 }
   0x6   :  { %p264_p0 = scmp.ne.s32.totalorder %s31_s19, %s263_s22  ;;  %p269_p2 = scmp.lt.s32.totalorder %s263_s22, %s263_s22 }
   0x8   :  { %p270_p3 = por %p269_p2, %p268_p1 }
   0xa   :  { %p271_p4 = pnand %p270_p3, %p264_p0 }
   0xc   :  { %274 = shalt.err (!%p271_p4)
}
   0xd   :  { %33 = dma.hbm_to_vmem [thread:$0]  %s421_s1, 128, %s31_s19, [#allocation6]  }
   0xe   :  { %s283_s25 = scalar_lea.vmem %s21_s21, 128  ;;  %p288_p6 = scmp.lt.s32.totalorder %s21_s21, %s21_s21 }
   0xf   :  { %p284_p5 = scmp.ne.s32.totalorder %s21_s21, %s283_s25  ;;  %p289_p7 = scmp.lt.s32.totalorder %s283_s25, %s283_s25 }
  0x11   :  { %p290_p8 = por %p289_p7, %p288_p6 }
  0x13   :  { %p291_p9 = pnand %p290_p8, %p284_p5 }
  0x15   :  { %294 = shalt.err (!%p291_p9)
}
  0x16   :  { %23 = dma.hbm_to_vmem [thread:$0]  %s420_s0, 128, %s21_s21, [#allocation3]  }
  0x17   :  { %s365_s28 = smov [#allocation7]  }
  0x18   :  { %s39_s29 = sshll.u32 %s365_s28, 4  ;;  %s40_s29 = int_to_ptr.vmem [resolvable:$true] %s39_s29 }
  0x19   :  { %s303_s30 = scalar_lea.vmem %s40_s29, 128  ;;  %p308_p11 = scmp.lt.s32.totalorder %s40_s29, %s40_s29 }
  0x1a   :  { %p304_p10 = scmp.ne.s32.totalorder %s40_s29, %s303_s30  ;;  %p309_p12 = scmp.lt.s32.totalorder %s303_s30, %s303_s30 }
  0x1c   :  { %p310_p13 = por %p309_p12, %p308_p11 }
  0x1e   :  { %p311_p0 = pnand %p310_p13, %p304_p10 }
  0x20   :  { %314 = shalt.err (!%p311_p0)
}
  0x21   :  { %s366_s1 = smov 64   ;;  %s367_s6 = smov 4  }
  0x22   :  { %45 = dma.hbm_to_vmem [thread:$0]  %s422_s2, 128, %s40_s29, [#allocation6], %s366_s1, %s366_s1, %s367_s6  }
  0x23   :  { %s368_s9 = smov [#allocation8]  }
  0x24   :  { %s51_s10 = sshll.u32 %s368_s9, 4  ;;  %s52_s10 = int_to_ptr.vmem [resolvable:$true] %s51_s10 }
  0x25   :  { %s323_s0 = scalar_lea.vmem %s52_s10, 256  ;;  %p328_p2 = scmp.lt.s32.totalorder %s52_s10, %s52_s10 }
  0x26   :  { %p324_p1 = scmp.ne.s32.totalorder %s52_s10, %s323_s0  ;;  %p329_p3 = scmp.lt.s32.totalorder %s323_s0, %s323_s0 }
  0x28   :  { %p330_p4 = por %p329_p3, %p328_p2 }
  0x2a   :  { %p331_p5 = pnand %p330_p4, %p324_p1 }
  0x2c   :  { %334 = shalt.err (!%p331_p5)
}
  0x2d   :  { %57 = dma.hbm_to_vmem [thread:$0]  %s423_s3, 256, %s52_s10, [#allocation9], %s366_s1, %s366_s1, %s367_s6  }
  0x2e   :  { %355 = dma.done.wait [#allocation3], 128  }
  0x2f   :  { %356 = vsyncadd [#allocation3], 4294967168 }
  0x30   :  { %357 = dma.done.wait [#allocation6], 256  }
  0x31   :  { %358 = vsyncadd [#allocation6], 4294967040 }
  0x32   :  { %359 = dma.done.wait [#allocation9], 256  }
  0x33   :  { %360 = vsyncadd [#allocation9], 4294967040  ;;  %v369_v0 = vmov 0.0   ;;  %vm370_vm0 = vmmov 0   ;;  %v250_v1 = vld [vmem:[#allocation8 + $0x8] sm:$0xff]   ;;  %v251_v2 = vld [vmem:[#allocation7] sm:$0xff]  }
  0x34   :  { %227 = vmatprep.subr.bf16.mxu0 %v369_v0  ;;  %235 = vmatprep.subr.bf16.mxu1 %v369_v0  ;;  %v73_v3 = vld [vmem:[#allocation2] sm:$0xff]  ;;  %vm145_vm1 = vcmask 130048   ;;  %v252_v5 = vld [vmem:[#allocation8] sm:$0xff]   ;;  %v77_v6 = vld [vmem:[#allocation5] sm:$0xff]  ;;  %vm95_vm2 = vcmask 261120   ;;  %s371_s13 = smov [#allocation10]  }
  0x35   :  { %237 = vmatprep.mubr.msk.bf16.mxu1 %vm370_vm0, %v369_v0  ;;  %231 = vmatprep.mubr.msk.bf16.mxu0 %vm370_vm0, %v369_v0  ;;  %v74_v4 = vpack.c.bf16 %v73_v3, %v73_v3  ;;  %v78_v7 = vpack.c.bf16 %v77_v6, %v77_v6  ;;  %v221_v11 = vld [vmem:[%s424_s4] ss:$0 sm:$0xff]  ;;  %s205_s14 = sshll.u32 %s371_s13, 4  ;;  %s206_s14 = int_to_ptr.vmem [resolvable:$true] %s205_s14 }
  0x36   :  { %228 = vmatpush3.bf16.msra.mxu0 %v250_v1  ;;  %236 = vmatpush3.bf16.msra.mxu1 %v251_v2  ;;  %s335_s15 = scalar_lea.vmem %s206_s14, 128  ;;  %p340_p7 = scmp.lt.s32.totalorder %s206_s14, %s206_s14 }
  0x37   :  { %229 = vmatprep.subr.bf16.mxu0 %v369_v0  ;;  %p336_p6 = scmp.ne.s32.totalorder %s206_s14, %s335_s15  ;;  %p341_p8 = scmp.lt.s32.totalorder %s335_s15, %s335_s15 }
  0x39   :  { %238 = vmatmul.mubr.msk.bf16.vlgmr.msra.gmra.mxu1 %vm145_vm1, %v74_v4  ;;  %p342_p9 = por %p341_p8, %p340_p7 }
  0x3a   :  { %230 = vmatpush3.bf16.msra.mxu0 %v252_v5 }
  0x3b   :  { %p343_p10 = pnand %p342_p9, %p336_p6 }
  0x3d   :  { %232 = vmatmul.mubr.msk.bf16.vlgmr.msra.gmra.mxu0 %vm95_vm2, %v78_v7 }
  0xf9   :  { %v183_v8 = vpop.f32.mrf.mxu1 }
  0xfb   :  { %v239_v9 = vpop.f32.mrf.mxu1 }
  0xfd   :  { %v133_v10 = vpop.f32.mrf.mxu0  ;;  %v186_v13 = vpop.f32.mrf.mxu1 }
  0xfe   :  { %v184_v12 = vadd.f32 %v183_v8, %v133_v10 }
  0xff   :  { %v233_v14 = vpop.f32.mrf.mxu0  ;;  %v240_v16 = vpop.f32.mrf.mxu1 }
 0x100   :  { %v196_v15 = vadd.f32 %v221_v11, %v184_v12 }
 0x101   :  { %v136_v17 = vpop.f32.mrf.mxu0 }
 0x102   :  { %253 = vtanh.f32 %v196_v15 }
 0x103   :  { %v234_v18 = vpop.f32.mrf.mxu0 }
 0x10f   :  { %v254_v19 = vpop.eup %253 }
 0x110   :  { %198 = vst [vmem:[#allocation10] sm:$0xff] %v254_v19 }
 0x111   :  { %346 = shalt.err (!%p343_p10)
}
 0x112   :  { %208 = dma.vmem_to_hbm [thread:$0]  %s206_s14, 128, %s425_s5, [#allocation4]  }
 0x113   :  { %361 = dma.done.wait [#allocation4], 128  }
 0x114   :  { %362 = vsyncadd [#allocation4], 4294967168 }
 0x115   :  { %212 = vsyncpa [#allocation3], 1 }
 0x116   :  { %213 = vsyncpa [#allocation6], 1 }
 0x117   :  { %214 = vsyncpa [#allocation9], 1 }
 0x118   :  { %215 = vsyncpa [#allocation4], 1 }

</bundles_post_ra>
